<compile_context>
chip_gen: v7x
topology: tpu7x:2x2x1
jax: 0.10.0
libtpu: 0.0.40
codegen_flags: <defaults>
</compile_context>

<pallas_src>
import math

import jax
import jax.numpy as jnp
from jax import lax
from jax.experimental import pallas as pl
from jax.experimental.pallas import tpu as pltpu

# ---- module hyper-parameters (from nn.Module __init__ defaults) ------------
P = 0.05
ALPHA = -1.7580993408473766
FIXED_POINT_MEAN = 0.0
FIXED_POINT_VAR = 1.0
KEEP_PROB = 1.0 - P
A = math.sqrt(
    FIXED_POINT_VAR
    / (KEEP_PROB * ((1.0 - KEEP_PROB) * (ALPHA - FIXED_POINT_MEAN) ** 2 + FIXED_POINT_VAR))
)
B = FIXED_POINT_MEAN - A * (KEEP_PROB * FIXED_POINT_MEAN + (1.0 - KEEP_PROB) * ALPHA)

LANES = 128
ROW_TILE = 1024  # 1024x128 f32 = 512 KiB/block; (in+out) x 2 pipeline bufs = 2 MiB VMEM
KEEP_THRESH_31 = int(round(KEEP_PROB * (1 << 31)))  # keep iff 31-bit hash < thresh


def _splitmix32(seed: int) -> int:
    """Host-side 32-bit mix of the user seed (decorrelates independent calls)."""
    x = (int(seed) + 0x9E3779B9) & 0xFFFFFFFF
    x ^= x >> 16
    x = (x * 0x7FEB352D) & 0xFFFFFFFF
    x ^= x >> 15
    x = (x * 0x846CA68B) & 0xFFFFFFFF
    x ^= x >> 16
    return x


def _alpha_drop_kernel(seed_ref, x_ref, o_ref):
    block_rows, lanes = x_ref.shape
    i = pl.program_id(0)

    # Global element index of every lane of this block (int32; wrap is fine).
    row = lax.broadcasted_iota(jnp.int32, (block_rows, lanes), 0)
    col = lax.broadcasted_iota(jnp.int32, (block_rows, lanes), 1)
    idx = (i * block_rows + row) * lanes + col

    # Counter-based PRNG: splitmix32 finalizer of (index + mixed seed).
    h = (idx + seed_ref[0]).astype(jnp.uint32)
    h = h ^ (h >> jnp.uint32(16))
    h = h * jnp.uint32(0x7FEB352D)
    h = h ^ (h >> jnp.uint32(15))
    h = h * jnp.uint32(0x846CA68B)
    h = h ^ (h >> jnp.uint32(16))

    # keep iff uniform 31-bit value < keep_prob * 2^31 (both operands are
    # non-negative, so a signed compare equals the unsigned compare).
    keep = (h >> jnp.uint32(1)).astype(jnp.int32) < jnp.int32(KEEP_THRESH_31)

    x = x_ref[...].astype(jnp.float32)
    kept = x * jnp.float32(A) + jnp.float32(B)
    dropped = jnp.float32(ALPHA * A + B)
    o_ref[...] = jnp.where(keep, kept, dropped).astype(o_ref.dtype)


def alpha_drop(x, seed, *, training=True):
    """Alpha dropout forward. `x` any shape float array; `seed` python int."""
    if KEEP_PROB == 1.0 or not training:
        return x

    orig_shape = x.shape
    flat = x.reshape(-1)
    n = flat.shape[0]

    # Minimal padding: only up to a whole number of 128-lane rows.
    pad = (-n) % LANES
    if pad:
        flat = jnp.pad(flat, (0, pad))
    rows = flat.shape[0] // LANES
    slab = flat.reshape(rows, LANES)

    # Big lane-dense blocks; a single full-array block for small inputs.
    block_rows = rows if rows <= ROW_TILE else ROW_TILE
    grid = (pl.cdiv(rows, block_rows),)

    mixed = _splitmix32(seed)
    if mixed >= (1 << 31):  # reinterpret the 32-bit pattern as int32
        mixed -= 1 << 32
    seed_arr = jnp.asarray([mixed], dtype=jnp.int32)

    nbytes = rows * LANES * 4
    out = pl.pallas_call(
        _alpha_drop_kernel,
        out_shape=jax.ShapeDtypeStruct((rows, LANES), slab.dtype),
        grid_spec=pltpu.PrefetchScalarGridSpec(
            num_scalar_prefetch=1,
            grid=grid,
            in_specs=[pl.BlockSpec((block_rows, LANES), lambda i, seed: (i, 0))],
            out_specs=pl.BlockSpec((block_rows, LANES), lambda i, seed: (i, 0)),
        ),
        compiler_params=pltpu.CompilerParams(
            # Mask depends only on each block's own indices -> iterations are
            # fully independent; "parallel" lets v7x split across both TCs.
            dimension_semantics=("parallel",),
        ),
        cost_estimate=pl.CostEstimate(
            flops=4 * rows * LANES, transcendentals=0, bytes_accessed=2 * nbytes
        ),
    )(seed_arr, slab)

    out_flat = out.reshape(-1)
    if pad:
        out_flat = out_flat[:n]
    return out_flat.reshape(orig_shape)


if __name__ == "__main__":
    key = jax.random.PRNGKey(0)
    x = jax.random.normal(key, (2, 4, 16, 16), dtype=jnp.float32)  # NCHW

    y = alpha_drop(x, seed=0, training=True)
    jax.block_until_ready(y)

    # Semantics check: every output element is either x*a + b (kept) or
    # alpha*a + b (dropped).
    kept_val = x * jnp.float32(A) + jnp.float32(B)
    drop_val = jnp.float32(ALPHA * A + B)
    is_kept = jnp.isclose(y, kept_val, atol=1e-5)
    is_drop = jnp.isclose(y, drop_val, atol=1e-5)
    assert bool(jnp.all(is_kept | is_drop)), "output not in {kept, dropped} set"

    # Drop rate should be near p = 0.05 (loose bounds; 2048 elements).
    drop_frac = float(jnp.mean((is_drop & ~is_kept).astype(jnp.float32)))
    assert 0.005 < drop_frac < 0.2, f"unexpected drop fraction {drop_frac}"

    # Different seeds produce different masks.
    y2 = alpha_drop(x, seed=1, training=True)
    assert bool(jnp.any(y2 != y)), "seed did not change the mask"

    # Eval mode is the identity.
    y_eval = alpha_drop(x, seed=0, training=False)
    assert bool(jnp.all(y_eval == x))

    print("KERNEL_OK")
</pallas_src>

<mosaic_0001>
module attributes {stable_mosaic.version = 11 : i64} {
  func.func @_alpha_drop_kernel(%arg0: i32, %arg1: memref<1xi32, #tpu.memory_space<smem>>, %arg2: memref<16x128xf32, #tpu.memory_space<vmem>>, %arg3: memref<16x128xf32, #tpu.memory_space<vmem>>) attributes {dimension_semantics = [#tpu.dimension_semantics<parallel>], iteration_bounds = array<i64: 1>, scalar_prefetch = 1 : i64, scratch_operands = 0 : i64, tpu.core_type = #tpu.core_type<tc>, window_params = [{transform_indices = @transform_0, window_bounds = array<i64: 16, 128>}, {transform_indices = @transform_1, window_bounds = array<i64: 16, 128>}]} {
    %0 = tpu.iota {dimensions = array<i32: 0>} : vector<16x128xi32>
    %1 = tpu.iota {dimensions = array<i32: 1>} : vector<16x128xi32>
    %c16_i32 = arith.constant 16 : i32
    %2 = arith.muli %arg0, %c16_i32 : i32
    %3 = vector.broadcast %2 : i32 to vector<16x128xi32>
    %4 = arith.addi %3, %0 : vector<16x128xi32>
    %c128_i32 = arith.constant 128 : i32
    %5 = vector.broadcast %c128_i32 : i32 to vector<16x128xi32>
    %6 = arith.muli %4, %5 : vector<16x128xi32>
    %7 = arith.addi %6, %1 : vector<16x128xi32>
    %c0 = arith.constant 0 : index
    %8 = memref.load %arg1[%c0] : memref<1xi32, #tpu.memory_space<smem>>
    %9 = vector.broadcast %8 : i32 to vector<16x128xi32>
    %10 = arith.addi %7, %9 : vector<16x128xi32>
    %c16_i32_0 = arith.constant 16 : i32
    %11 = vector.broadcast %c16_i32_0 : i32 to vector<16x128xi32>
    %12 = arith.shrui %10, %11 : vector<16x128xi32>
    %13 = arith.xori %10, %12 : vector<16x128xi32>
    %c2146121005_i32 = arith.constant 2146121005 : i32
    %14 = vector.broadcast %c2146121005_i32 : i32 to vector<16x128xi32>
    %15 = arith.muli %13, %14 : vector<16x128xi32>
    %c15_i32 = arith.constant 15 : i32
    %16 = vector.broadcast %c15_i32 : i32 to vector<16x128xi32>
    %17 = arith.shrui %15, %16 : vector<16x128xi32>
    %18 = arith.xori %15, %17 : vector<16x128xi32>
    %c-2073254261_i32 = arith.constant -2073254261 : i32
    %19 = vector.broadcast %c-2073254261_i32 : i32 to vector<16x128xi32>
    %20 = arith.muli %18, %19 : vector<16x128xi32>
    %c16_i32_1 = arith.constant 16 : i32
    %21 = vector.broadcast %c16_i32_1 : i32 to vector<16x128xi32>
    %22 = arith.shrui %20, %21 : vector<16x128xi32>
    %23 = arith.xori %20, %22 : vector<16x128xi32>
    %c1_i32 = arith.constant 1 : i32
    %24 = vector.broadcast %c1_i32 : i32 to vector<16x128xi32>
    %25 = arith.shrui %23, %24 : vector<16x128xi32>
    %c2040109466_i32 = arith.constant 2040109466 : i32
    %26 = vector.broadcast %c2040109466_i32 : i32 to vector<16x128xi32>
    %27 = arith.cmpi slt, %25, %26 : vector<16x128xi32>
    %c0_2 = arith.constant 0 : index
    %c0_3 = arith.constant 0 : index
    %28 = vector.load %arg2[%c0_2, %c0_3] : memref<16x128xf32, #tpu.memory_space<vmem>>, vector<16x128xf32>
    %cst = arith.constant 0.954844474 : f32
    %29 = vector.broadcast %cst : f32 to vector<16x128xf32>
    %30 = arith.mulf %28, %29 : vector<16x128xf32>
    %cst_4 = arith.constant 0.0839355737 : f32
    %31 = vector.broadcast %cst_4 : f32 to vector<16x128xf32>
    %32 = arith.addf %30, %31 : vector<16x128xf32>
    %cst_5 = arith.constant -1.59477592 : f32
    %33 = vector.broadcast %cst_5 : f32 to vector<16x128xf32>
    %34 = arith.select %27, %32, %33 : vector<16x128xi1>, vector<16x128xf32>
    %c0_6 = arith.constant 0 : index
    %c0_7 = arith.constant 0 : index
    %35 = vector.load %arg3[%c0_6, %c0_7] : memref<16x128xf32, #tpu.memory_space<vmem>>, vector<16x128xf32>
    tpu.vector_store %arg3[%c0_6, %c0_7], %34 {strides = array<i32>} : memref<16x128xf32, #tpu.memory_space<vmem>>, vector<16x128xf32>,
    return
  }
  func.func @transform_0(%arg0: i32, %arg1: memref<1xi32, #tpu.memory_space<smem>>) -> (i32, i32) {
    %c0_i32 = arith.constant 0 : i32
    %c0_i32_0 = arith.constant 0 : i32
    return %arg0, %c0_i32 : i32, i32
  }
  func.func @transform_1(%arg0: i32, %arg1: memref<1xi32, #tpu.memory_space<smem>>) -> (i32, i32) {
    %c0_i32 = arith.constant 0 : i32
    %c0_i32_0 = arith.constant 0 : i32
    return %arg0, %c0_i32 : i32, i32
  }
}

</mosaic_0001>

<bundles_post_ra>
// kernel: tpu_custom_call.1
= control target key start
LH: loop header
LB: loop body
LE: loop exit
PB: predicated region body
PF: predicated region fallthrough
CT: control target
= control target key end

     0   :  { %8 = vsyncpa [#allocation5], 0  ;;  %s193_s0 = inlined_call_operand.<no memory space> [shape: s32[1], index: 0, kind: input, shape index: {}]   ;;  %s194_s1 = inlined_call_operand.hbm [shape: f32[16,128], index: 1, kind: input, shape index: {}]   ;;  %s195_s2 = inlined_call_operand.hbm [shape: f32[16,128], index: 2, kind: output, shape index: {}]  }
   0x1   :  { %9 = vsyncpa [#allocation6], 0  ;;  %s141_s9 = smov [#allocation4]   ;;  %s93_s13 = scalar_lea.hbm %s194_s1, 256 }
   0x2   :  { %s15_s10 = sshll.u32 %s141_s9, 4  ;;  %p94_p0 = scmp.ne.s32.totalorder %s194_s1, %s93_s13  ;;  %s16_s10 = int_to_ptr.vmem [resolvable:$true] %s15_s10 }
   0x3   :  { %p97_p1 = scmp.lt.u32.totalorder %s93_s13, %s194_s1 }
   0x5   :  { %p99_p2 = pnand %p97_p1, %p94_p0 }
   0x7   :  { %102 = shalt.err (!%p99_p2)
}
   0x8   :  { %s103_s18 = scalar_lea.vmem %s16_s10, 256  ;;  %p108_p4 = scmp.lt.s32.totalorder %s16_s10, %s16_s10 }
   0x9   :  { %p104_p3 = scmp.ne.s32.totalorder %s16_s10, %s103_s18  ;;  %p109_p5 = scmp.lt.s32.totalorder %s103_s18, %s103_s18 }
   0xb   :  { %p110_p6 = por %p109_p5, %p108_p4 }
   0xd   :  { %p111_p7 = pnand %p110_p6, %p104_p3 }
   0xf   :  { %114 = shalt.err (!%p111_p7)
}
  0x10   :  { %s142_s19 = smov 128   ;;  %s143_s20 = smov 8  }
  0x11   :  { %21 = dma.hbm_to_vmem [thread:$0]  %s194_s1, 256, %s16_s10, [#allocation5], %s142_s19, %s142_s19, %s143_s20  }
  0x12   :  { %137 = dma.done.wait [#allocation5], 256  }
  0x13   :  { %138 = vsyncadd [#allocation5], 4294967040  ;;  %v25_v0 = vlaneseq  ;;  %v39_v5 = vstv %s193_s0  ;;  %v62_v19 = vld [vmem:[#allocation4] sm:$0xff]  ;;  %v63_v23 = vld [vmem:[#allocation4 + $0x8] sm:$0xff]  ;;  %s144_s0 = smov [#allocation7]  }
  0x14   :  { %v64_v24 = vmul.f32 0.9548445, %v62_v19  ;;  %v65_v27 = vmul.f32 0.9548445, %v63_v23  ;;  %s77_s1 = sshll.u32 %s144_s0, 4  ;;  %s78_s1 = int_to_ptr.vmem [resolvable:$true] %s77_s1 }
  0x15   :  { %v26_v1 = vshrl.u32 %v25_v0, 7  ;;  %v29_v2 = vand.u32 127, %v25_v0  ;;  %s115_s25 = scalar_lea.vmem %s78_s1, 256  ;;  %p120_p9 = scmp.lt.s32.totalorder %s78_s1, %s78_s1 }
  0x16   :  { %v66_v30 = vadd.f32 0.08393557, %v64_v24  ;;  %v67_v33 = vadd.f32 0.08393557, %v65_v27  ;;  %p116_p8 = scmp.ne.s32.totalorder %s78_s1, %s115_s25  ;;  %p121_p10 = scmp.lt.s32.totalorder %s115_s25, %s115_s25 }
  0x17   :  { %v34_v3 = vmul.u32 128, %v26_v1  ;;  %v27_v4 = vadd.s32 8, %v26_v1 }
  0x18   :  { %p122_p11 = por %p121_p10, %p120_p9 }
  0x19   :  { %v36_v6 = vadd.s32 %v34_v3, %v29_v2  ;;  %v35_v7 = vmul.u32 128, %v27_v4 }
  0x1a   :  { %p123_p12 = pnand %p122_p11, %p116_p8 }
  0x1b   :  { %v40_v8 = vadd.s32 %v39_v5, %v36_v6  ;;  %v37_v9 = vadd.s32 %v35_v7, %v29_v2 }
  0x1d   :  { %v42_v10 = vshrl.u32 %v40_v8, 16  ;;  %v41_v11 = vadd.s32 %v39_v5, %v37_v9 }
  0x1f   :  { %v44_v12 = vxor.u32 %v42_v10, %v40_v8  ;;  %v43_v13 = vshrl.u32 %v41_v11, 16 }
  0x21   :  { %v46_v14 = vmul.u32 2146121005, %v44_v12  ;;  %v45_v15 = vxor.u32 %v43_v13, %v41_v11 }
  0x23   :  { %v48_v16 = vshrl.u32 %v46_v14, 15  ;;  %v47_v17 = vmul.u32 2146121005, %v45_v15 }
  0x25   :  { %v50_v18 = vxor.u32 %v48_v16, %v46_v14  ;;  %v49_v20 = vshrl.u32 %v47_v17, 15 }
  0x27   :  { %v52_v21 = vmul.u32 2221713035, %v50_v18  ;;  %v51_v22 = vxor.u32 %v49_v20, %v47_v17 }
  0x29   :  { %v54_v25 = vshrl.u32 %v52_v21, 16  ;;  %v53_v26 = vmul.u32 2221713035, %v51_v22 }
  0x2b   :  { %v56_v28 = vxor.u32 %v54_v25, %v52_v21  ;;  %v55_v29 = vshrl.u32 %v53_v26, 16 }
  0x2d   :  { %v58_v31 = vshrl.u32 %v56_v28, 1  ;;  %v57_v32 = vxor.u32 %v55_v29, %v53_v26 }
  0x2f   :  { %vm60_vm0 = vcmp.lt.s32.totalorder %v58_v31, 2040109466  ;;  %v59_v34 = vshrl.u32 %v57_v32, 1 }
  0x30   :  { %v68_v35 = vsel %vm60_vm0, %v66_v30, -1.5947759 }
  0x31   :  { %70 = vst [vmem:[#allocation7] sm:$0xff] %v68_v35  ;;  %vm61_vm1 = vcmp.lt.s32.totalorder %v59_v34, 2040109466 }
  0x32   :  { %v69_v36 = vsel %vm61_vm1, %v67_v33, -1.5947759 }
  0x33   :  { %71 = vst [vmem:[#allocation7 + $0x8] sm:$0xff] %v69_v36 }
  0x34   :  { %126 = shalt.err (!%p123_p12)
}
  0x35   :  { %s127_s28 = scalar_lea.hbm %s195_s2, 256 }
  0x36   :  { %p128_p13 = scmp.ne.s32.totalorder %s195_s2, %s127_s28  ;;  %p131_p0 = scmp.lt.u32.totalorder %s127_s28, %s195_s2 }
  0x38   :  { %p133_p1 = pnand %p131_p0, %p128_p13 }
  0x3a   :  { %136 = shalt.err (!%p133_p1)
}
  0x3b   :  { %83 = dma.vmem_to_hbm [thread:$0]  %s78_s1, 256, %s195_s2, [#allocation6], %s142_s19, %s142_s19, %s143_s20  }
  0x3c   :  { %139 = dma.done.wait [#allocation6], 256  }
  0x3d   :  { %140 = vsyncadd [#allocation6], 4294967040 }
  0x3e   :  { %87 = vsyncpa [#allocation5], 1 }
  0x3f   :  { %88 = vsyncpa [#allocation6], 1 }

</bundles_post_ra>
